<compile_context>
chip_gen: v6e
topology: v6e:2x2x1
jax: 0.10.0
libtpu: 0.0.40
codegen_flags: <defaults>
</compile_context>

<pallas_src>
import functools

import jax
import jax.numpy as jnp
from jax.experimental import pallas as pl
from jax.experimental.pallas import tpu as pltpu

EPS = 1e-5
LANE = 128
SUB = 8
_VMEM_LIMIT = 32 * 1024 * 1024


def _round_up(x, m):
    return (x + m - 1) // m * m


# ------------------- Pass A: tiled matmul + per-tile partial BN stats -------------------
def _matmul_stats_kernel(p_ref, w_ref, y_ref, ps_ref):
    # p_ref: (tm, K) patches; w_ref: (K, Cp) weights (bf16 or f32)
    # y_ref: (tm, Cp) pre-BN activations; ps_ref: (1, 2, Cp) this tile's [sum, sumsq].
    acc = jnp.dot(p_ref[...], w_ref[...], preferred_element_type=jnp.float32)  # MXU, f32 acc
    y_ref[...] = acc.astype(y_ref.dtype)
    s = jnp.sum(acc, axis=0, keepdims=True)            # cross-sublane reduce -> XLU (free slot)
    ss = jnp.sum(acc * acc, axis=0, keepdims=True)
    ps_ref[...] = jnp.concatenate([s, ss], axis=0)[None]


def _conv_pass_a(patches, w_flat, *, tm, y_dtype):
    m_pad, k = patches.shape
    cp = w_flat.shape[1]
    mt = m_pad // tm
    return pl.pallas_call(
        _matmul_stats_kernel,
        out_shape=(jax.ShapeDtypeStruct((m_pad, cp), y_dtype),
                   jax.ShapeDtypeStruct((mt, 2, cp), jnp.float32)),
        grid=(mt,),
        in_specs=[
            pl.BlockSpec((tm, k), lambda i: (i, 0)),        # patches: streamed, double-buffered
            pl.BlockSpec((k, cp), lambda i: (0, 0)),        # weights: resident
        ],
        out_specs=(
            pl.BlockSpec((tm, cp), lambda i: (i, 0)),       # pre-BN activations (lane-dense)
            pl.BlockSpec((1, 2, cp), lambda i: (i, 0, 0)),  # per-tile partial stats
        ),
        compiler_params=pltpu.CompilerParams(
            dimension_semantics=("parallel",),
            vmem_limit_bytes=_VMEM_LIMIT),
    )(patches, w_flat)


# ------------------- Pass B: fused per-channel scale/shift + ReLU stream -------------------
def _bn_relu_kernel(y_ref, sc_ref, sh_ref, o_ref):
    y = y_ref[...].astype(jnp.float32)
    o_ref[...] = jnp.maximum(y * sc_ref[...] + sh_ref[...], 0.0).astype(o_ref.dtype)


def _bn_relu_cfirst_kernel(y_ref, sc_ref, sh_ref, o_ref):
    # Channels-first flat variant: (tm, Cp) -> keep first Cs channels -> (Cs, tm).
    # The transpose goes to the XLU; this pass is mem-bound so the slot is free.
    y = y_ref[...].astype(jnp.float32)
    r = jnp.maximum(y * sc_ref[...] + sh_ref[...], 0.0)
    cs = o_ref.shape[0]
    o_ref[...] = r.T[:cs, :].astype(o_ref.dtype)


def _conv_pass_b(y, scale, shift, *, tm, out_dtype):
    m_pad, cp = y.shape
    mt = m_pad // tm
    return pl.pallas_call(
        _bn_relu_kernel,
        out_shape=jax.ShapeDtypeStruct((m_pad, cp), out_dtype),
        grid=(mt,),
        in_specs=[
            pl.BlockSpec((tm, cp), lambda i: (i, 0)),
            pl.BlockSpec((1, cp), lambda i: (0, 0)),
            pl.BlockSpec((1, cp), lambda i: (0, 0)),
        ],
        out_specs=pl.BlockSpec((tm, cp), lambda i: (i, 0)),
        compiler_params=pltpu.CompilerParams(
            dimension_semantics=("parallel",),
            vmem_limit_bytes=_VMEM_LIMIT),
    )(y, scale, shift)


def _conv_pass_b_cfirst(y, scale, shift, *, tm, out_dtype, c_sub):
    m_pad, cp = y.shape
    mt = m_pad // tm
    return pl.pallas_call(
        _bn_relu_cfirst_kernel,
        out_shape=jax.ShapeDtypeStruct((c_sub, m_pad), out_dtype),
        grid=(mt,),
        in_specs=[
            pl.BlockSpec((tm, cp), lambda i: (i, 0)),
            pl.BlockSpec((1, cp), lambda i: (0, 0)),
            pl.BlockSpec((1, cp), lambda i: (0, 0)),
        ],
        out_specs=pl.BlockSpec((c_sub, tm), lambda i: (0, i)),  # lane-dense across M, no C pad
        compiler_params=pltpu.CompilerParams(
            dimension_semantics=("parallel",),
            vmem_limit_bytes=_VMEM_LIMIT),
    )(y, scale, shift)


# ----------------------------------- wrapper glue -----------------------------------
def _im2col_3x3(x_nhwc):
    """(N,H,W,C) -> (N*H*W, 9*C) patches for a 3x3, stride-1, pad-1 conv."""
    n, h, w, c = x_nhwc.shape
    xp = jnp.pad(x_nhwc, ((0, 0), (1, 1), (1, 1), (0, 0)))
    cols = [xp[:, ky:ky + h, kx:kx + w, :] for ky in range(3) for kx in range(3)]
    patches = jnp.concatenate(cols, axis=-1)            # (N,H,W,9C) tap-major, channel-minor
    return patches.reshape(n * h * w, 9 * c)


def _flatten_weight(w_oihw):
    """PyTorch (Cout,Cin,3,3) -> (9*Cin, Cout) matching im2col column order."""
    cout, cin = w_oihw.shape[0], w_oihw.shape[1]
    return jnp.transpose(w_oihw, (2, 3, 1, 0)).reshape(9 * cin, cout)


def _conv_bn_relu_stage(x_nhwc, w_oihw, gamma, beta, *, mxu_dtype, out_dtype, tm,
                        channels_first_out=False):
    n, h, w, cin = x_nhwc.shape
    cout = w_oihw.shape[0]
    cp = _round_up(cout, LANE)                  # lane-dense output channels for intermediates
    m = n * h * w
    m_pad = _round_up(m, tm)

    # TODO(synk): in-kernel halo loads instead of materialized im2col (see header note).
    patches = _im2col_3x3(x_nhwc).astype(mxu_dtype)
    if m_pad != m:
        patches = jnp.pad(patches, ((0, m_pad - m), (0, 0)))   # zero rows -> 0 contribution

    w_flat = jnp.pad(_flatten_weight(w_oihw), ((0, 0), (0, cp - cout))).astype(mxu_dtype)

    # Pass A: matmul + per-tile partial stats.
    y, pstats = _conv_pass_a(patches, w_flat, tm=tm, y_dtype=mxu_dtype)

    # Finalize BatchNorm (training-mode, biased variance) and fold into scale & shift.
    totals = jnp.sum(pstats, axis=0)                            # (2, cp)
    mean = totals[0] / m                                        # divide by TRUE row count
    var = jnp.maximum(totals[1] / m - mean * mean, 0.0)
    inv = jax.lax.rsqrt(var + EPS)
    g = jnp.pad(gamma.reshape(-1).astype(jnp.float32), (0, cp - cout))
    b = jnp.pad(beta.reshape(-1).astype(jnp.float32), (0, cp - cout))
    scale = (g * inv).reshape(1, cp)
    shift = (b - mean * g * inv).reshape(1, cp)

    if channels_first_out:
        # Final stage: write (Cout_sub, M) directly -> lane-dense over M, no channel-pad
        # writeback, and only a leading-axis permute left to reach NCHW.
        c_sub = _round_up(cout, SUB)
        out = _conv_pass_b_cfirst(y, scale, shift, tm=tm, out_dtype=out_dtype, c_sub=c_sub)
        out = out[:cout, :m].reshape(cout, n, h, w)
        return jnp.transpose(out, (1, 0, 2, 3))                 # (C,N,H,W) -> (N,C,H,W), cheap

    # Intermediate stage: keep NHWC-flat (M, Cp) for the next stage's im2col.
    out = _conv_pass_b(y, scale, shift, tm=tm, out_dtype=out_dtype)
    return out[:m, :cout].reshape(n, h, w, cout)


def double_conv(x_nchw, params, *, mxu_dtype=jnp.bfloat16, tm=512):
    """DoubleConv forward.  x_nchw: (N, Cin, H, W) float32 -> (N, Cout, H, W)."""
    w1, g1, b1, w2, g2, b2 = params
    x_nhwc = jnp.transpose(x_nchw, (0, 2, 3, 1))
    # Intermediate kept in mxu_dtype (halves stage-2 HBM traffic on the bf16 path).
    y1 = _conv_bn_relu_stage(x_nhwc, w1, g1, b1,
                             mxu_dtype=mxu_dtype, out_dtype=mxu_dtype, tm=tm)
    y2 = _conv_bn_relu_stage(y1, w2, g2, b2,
                             mxu_dtype=mxu_dtype, out_dtype=x_nchw.dtype, tm=tm,
                             channels_first_out=True)
    return y2


# ---------------- pure-JAX reference (for correctness check) ----------------
def _ref_double_conv(x, params):
    w1, g1, b1, w2, g2, b2 = params

    def conv_bn_relu_ref(x, w, g, b):
        y = jax.lax.conv_general_dilated(
            x, w, window_strides=(1, 1), padding=((1, 1), (1, 1)),
            dimension_numbers=("NCHW", "OIHW", "NCHW"))
        mean = jnp.mean(y, axis=(0, 2, 3), keepdims=True)
        var = jnp.mean(jnp.square(y - mean), axis=(0, 2, 3), keepdims=True)
        yhat = (y - mean) * jax.lax.rsqrt(var + EPS)
        yhat = yhat * g.reshape(1, -1, 1, 1) + b.reshape(1, -1, 1, 1)
        return jnp.maximum(yhat, 0.0)

    return conv_bn_relu_ref(conv_bn_relu_ref(x, w1, g1, b1), w2, g2, b2)


if __name__ == "__main__":
    # small shapes implied by the module: DoubleConv(in_channels=4, out_channels=8)
    N, Cin, Cout, H, W = 2, 4, 8, 16, 16

    key = jax.random.PRNGKey(0)
    kx, kw1, kw2 = jax.random.split(key, 3)

    x = jax.random.normal(kx, (N, Cin, H, W), dtype=jnp.float32)
    w1 = 0.1 * jax.random.normal(kw1, (Cout, Cin, 3, 3), dtype=jnp.float32)
    w2 = 0.1 * jax.random.normal(kw2, (Cout, Cout, 3, 3), dtype=jnp.float32)
    g1 = jnp.ones((Cout,), jnp.float32)
    b1 = jnp.zeros((Cout,), jnp.float32)
    g2 = jnp.ones((Cout,), jnp.float32)
    b2 = jnp.zeros((Cout,), jnp.float32)
    params = (w1, g1, b1, w2, g2, b2)

    ref = jax.block_until_ready(_ref_double_conv(x, params))

    # 1) exact-semantics path: f32 MXU inputs, small row tiles -> multi-tile grid that
    #    exercises the cross-tile BN-stats reduction and the channels-first final store.
    run_f32 = jax.jit(functools.partial(double_conv, mxu_dtype=jnp.float32, tm=128))
    out_f32 = jax.block_until_ready(run_f32(x, params))
    assert out_f32.shape == (N, Cout, H, W), out_f32.shape
    assert jnp.allclose(out_f32, ref, atol=5e-4, rtol=5e-4), \
        float(jnp.max(jnp.abs(out_f32 - ref)))

    # 2) default perf path: bf16 MXU inputs + bf16 intermediate (v6e/v7x recommendation),
    #    tm=512 row tiles.  Looser tolerance for reduced-precision matmul inputs.
    out_bf16 = jax.block_until_ready(jax.jit(double_conv)(x, params))
    assert out_bf16.shape == (N, Cout, H, W), out_bf16.shape
    assert jnp.allclose(out_bf16, ref, atol=5e-2, rtol=5e-2), \
        float(jnp.max(jnp.abs(out_bf16 - ref)))

    print("KERNEL_OK")
</pallas_src>

<mosaic_0001>
module attributes {stable_mosaic.version = 11 : i64} {
  func.func @_matmul_stats_kernel(%arg0: i32, %arg1: memref<128x36xf32, #tpu.memory_space<vmem>>, %arg2: memref<36x128xf32, #tpu.memory_space<vmem>>, %arg3: memref<128x128xf32, #tpu.memory_space<vmem>>, %arg4: memref<1x2x128xf32, #tpu.memory_space<vmem>>) attributes {dimension_semantics = [#tpu.dimension_semantics<parallel>], iteration_bounds = array<i64: 4>, scalar_prefetch = 0 : i64, scratch_operands = 0 : i64, tpu.core_type = #tpu.core_type<tc>, window_params = [{transform_indices = @transform_0, window_bounds = array<i64: 128, 36>}, {pipeline_mode = #tpu.pipeline_mode<synchronous>, transform_indices = @transform_1, window_bounds = array<i64: 36, 128>}, {transform_indices = @transform_2, window_bounds = array<i64: 128, 128>}, {transform_indices = @transform_3, window_bounds = array<i64: 1, 2, 128>}]} {
    %c0 = arith.constant 0 : index
    %c0_0 = arith.constant 0 : index
    %0 = vector.load %arg1[%c0, %c0_0] : memref<128x36xf32, #tpu.memory_space<vmem>>, vector<128x36xf32>
    %c0_1 = arith.constant 0 : index
    %c0_2 = arith.constant 0 : index
    %1 = vector.load %arg2[%c0_1, %c0_2] : memref<36x128xf32, #tpu.memory_space<vmem>>, vector<36x128xf32>
    %cst = arith.constant dense<0.000000e+00> : vector<128x128xf32>
    %2 = tpu.matmul %0, %1, %cst {dimension_numbers = #tpu.dot_dimension_numbers<[1], [0], [0], [1], [0, 0, 1, 1], [], []>} : vector<128x36xf32>, vector<36x128xf32>, vector<128x128xf32> -> vector<128x128xf32>
    %c0_3 = arith.constant 0 : index
    %c0_4 = arith.constant 0 : index
    %3 = vector.load %arg3[%c0_3, %c0_4] : memref<128x128xf32, #tpu.memory_space<vmem>>, vector<128x128xf32>
    tpu.vector_store %arg3[%c0_3, %c0_4], %2 {strides = array<i32>} : memref<128x128xf32, #tpu.memory_space<vmem>>, vector<128x128xf32>,
    %cst_5 = arith.constant dense<0.000000e+00> : vector<128xf32>
    %4 = vector.multi_reduction <add>, %2, %cst_5 [0] : vector<128x128xf32> to vector<128xf32>
    %5 = vector.shape_cast %4 : vector<128xf32> to vector<1x128xf32>
    %6 = arith.mulf %2, %2 : vector<128x128xf32>
    %cst_6 = arith.constant dense<0.000000e+00> : vector<128xf32>
    %7 = vector.multi_reduction <add>, %6, %cst_6 [0] : vector<128x128xf32> to vector<128xf32>
    %8 = vector.shape_cast %7 : vector<128xf32> to vector<1x128xf32>
    %9 = tpu.concatenate %5, %8 in 0 : vector<1x128xf32>, vector<1x128xf32> -> vector<2x128xf32>
    %10 = vector.shape_cast %9 : vector<2x128xf32> to vector<1x2x128xf32>
    %c0_7 = arith.constant 0 : index
    %c0_8 = arith.constant 0 : index
    %c0_9 = arith.constant 0 : index
    %11 = vector.load %arg4[%c0_7, %c0_8, %c0_9] : memref<1x2x128xf32, #tpu.memory_space<vmem>>, vector<1x2x128xf32>
    tpu.vector_store %arg4[%c0_7, %c0_8, %c0_9], %10 {strides = array<i32>} : memref<1x2x128xf32, #tpu.memory_space<vmem>>, vector<1x2x128xf32>,
    return
  }
  func.func @transform_0(%arg0: i32) -> (i32, i32) {
    %c0_i32 = arith.constant 0 : i32
    %c0_i32_0 = arith.constant 0 : i32
    return %arg0, %c0_i32 : i32, i32
  }
  func.func @transform_1(%arg0: i32) -> (i32, i32) {
    %c0_i32 = arith.constant 0 : i32
    %c0_i32_0 = arith.constant 0 : i32
    %c0_i32_1 = arith.constant 0 : i32
    return %c0_i32, %c0_i32_0 : i32, i32
  }
  func.func @transform_2(%arg0: i32) -> (i32, i32) {
    %c0_i32 = arith.constant 0 : i32
    %c0_i32_0 = arith.constant 0 : i32
    return %arg0, %c0_i32 : i32, i32
  }
  func.func @transform_3(%arg0: i32) -> (i32, i32, i32) {
    %c0_i32 = arith.constant 0 : i32
    %c0_i32_0 = arith.constant 0 : i32
    %c0_i32_1 = arith.constant 0 : i32
    return %arg0, %c0_i32, %c0_i32_0 : i32, i32, i32
  }
}

module attributes {stable_mosaic.version = 11 : i64} {
  func.func @_bn_relu_kernel(%arg0: i32, %arg1: memref<128x128xf32, #tpu.memory_space<vmem>>, %arg2: memref<1x128xf32, #tpu.memory_space<vmem>>, %arg3: memref<1x128xf32, #tpu.memory_space<vmem>>, %arg4: memref<128x128xf32, #tpu.memory_space<vmem>>) attributes {dimension_semantics = [#tpu.dimension_semantics<parallel>], iteration_bounds = array<i64: 4>, scalar_prefetch = 0 : i64, scratch_operands = 0 : i64, tpu.core_type = #tpu.core_type<tc>, window_params = [{transform_indices = @transform_0, window_bounds = array<i64: 128, 128>}, {pipeline_mode = #tpu.pipeline_mode<synchronous>, transform_indices = @transform_1, window_bounds = array<i64: 1, 128>}, {pipeline_mode = #tpu.pipeline_mode<synchronous>, transform_indices = @transform_2, window_bounds = array<i64: 1, 128>}, {transform_indices = @transform_3, window_bounds = array<i64: 128, 128>}]} {
    %c0 = arith.constant 0 : index
    %c0_0 = arith.constant 0 : index
    %0 = vector.load %arg1[%c0, %c0_0] : memref<128x128xf32, #tpu.memory_space<vmem>>, vector<128x128xf32>
    %c0_1 = arith.constant 0 : index
    %c0_2 = arith.constant 0 : index
    %1 = vector.load %arg2[%c0_1, %c0_2] : memref<1x128xf32, #tpu.memory_space<vmem>>, vector<1x128xf32>
    %2 = vector.broadcast %1 : vector<1x128xf32> to vector<128x128xf32>
    %3 = arith.mulf %0, %2 : vector<128x128xf32>
    %c0_3 = arith.constant 0 : index
    %c0_4 = arith.constant 0 : index
    %4 = vector.load %arg3[%c0_3, %c0_4] : memref<1x128xf32, #tpu.memory_space<vmem>>, vector<1x128xf32>
    %5 = vector.broadcast %4 : vector<1x128xf32> to vector<128x128xf32>
    %6 = arith.addf %3, %5 : vector<128x128xf32>
    %cst = arith.constant 0.000000e+00 : f32
    %7 = vector.broadcast %cst : f32 to vector<128x128xf32>
    %8 = arith.maximumf %6, %7 : vector<128x128xf32>
    %c0_5 = arith.constant 0 : index
    %c0_6 = arith.constant 0 : index
    %9 = vector.load %arg4[%c0_5, %c0_6] : memref<128x128xf32, #tpu.memory_space<vmem>>, vector<128x128xf32>
    tpu.vector_store %arg4[%c0_5, %c0_6], %8 {strides = array<i32>} : memref<128x128xf32, #tpu.memory_space<vmem>>, vector<128x128xf32>,
    return
  }
  func.func @transform_0(%arg0: i32) -> (i32, i32) {
    %c0_i32 = arith.constant 0 : i32
    %c0_i32_0 = arith.constant 0 : i32
    return %arg0, %c0_i32 : i32, i32
  }
  func.func @transform_1(%arg0: i32) -> (i32, i32) {
    %c0_i32 = arith.constant 0 : i32
    %c0_i32_0 = arith.constant 0 : i32
    %c0_i32_1 = arith.constant 0 : i32
    return %c0_i32, %c0_i32_0 : i32, i32
  }
  func.func @transform_2(%arg0: i32) -> (i32, i32) {
    %c0_i32 = arith.constant 0 : i32
    %c0_i32_0 = arith.constant 0 : i32
    %c0_i32_1 = arith.constant 0 : i32
    return %c0_i32, %c0_i32_0 : i32, i32
  }
  func.func @transform_3(%arg0: i32) -> (i32, i32) {
    %c0_i32 = arith.constant 0 : i32
    %c0_i32_0 = arith.constant 0 : i32
    return %arg0, %c0_i32 : i32, i32
  }
}

module attributes {stable_mosaic.version = 11 : i64} {
  func.func @_matmul_stats_kernel(%arg0: i32, %arg1: memref<128x72xf32, #tpu.memory_space<vmem>>, %arg2: memref<72x128xf32, #tpu.memory_space<vmem>>, %arg3: memref<128x128xf32, #tpu.memory_space<vmem>>, %arg4: memref<1x2x128xf32, #tpu.memory_space<vmem>>) attributes {dimension_semantics = [#tpu.dimension_semantics<parallel>], iteration_bounds = array<i64: 4>, scalar_prefetch = 0 : i64, scratch_operands = 0 : i64, tpu.core_type = #tpu.core_type<tc>, window_params = [{transform_indices = @transform_0, window_bounds = array<i64: 128, 72>}, {pipeline_mode = #tpu.pipeline_mode<synchronous>, transform_indices = @transform_1, window_bounds = array<i64: 72, 128>}, {transform_indices = @transform_2, window_bounds = array<i64: 128, 128>}, {transform_indices = @transform_3, window_bounds = array<i64: 1, 2, 128>}]} {
    %c0 = arith.constant 0 : index
    %c0_0 = arith.constant 0 : index
    %0 = vector.load %arg1[%c0, %c0_0] : memref<128x72xf32, #tpu.memory_space<vmem>>, vector<128x72xf32>
    %c0_1 = arith.constant 0 : index
    %c0_2 = arith.constant 0 : index
    %1 = vector.load %arg2[%c0_1, %c0_2] : memref<72x128xf32, #tpu.memory_space<vmem>>, vector<72x128xf32>
    %cst = arith.constant dense<0.000000e+00> : vector<128x128xf32>
    %2 = tpu.matmul %0, %1, %cst {dimension_numbers = #tpu.dot_dimension_numbers<[1], [0], [0], [1], [0, 0, 1, 1], [], []>} : vector<128x72xf32>, vector<72x128xf32>, vector<128x128xf32> -> vector<128x128xf32>
    %c0_3 = arith.constant 0 : index
    %c0_4 = arith.constant 0 : index
    %3 = vector.load %arg3[%c0_3, %c0_4] : memref<128x128xf32, #tpu.memory_space<vmem>>, vector<128x128xf32>
    tpu.vector_store %arg3[%c0_3, %c0_4], %2 {strides = array<i32>} : memref<128x128xf32, #tpu.memory_space<vmem>>, vector<128x128xf32>,
    %cst_5 = arith.constant dense<0.000000e+00> : vector<128xf32>
    %4 = vector.multi_reduction <add>, %2, %cst_5 [0] : vector<128x128xf32> to vector<128xf32>
    %5 = vector.shape_cast %4 : vector<128xf32> to vector<1x128xf32>
    %6 = arith.mulf %2, %2 : vector<128x128xf32>
    %cst_6 = arith.constant dense<0.000000e+00> : vector<128xf32>
    %7 = vector.multi_reduction <add>, %6, %cst_6 [0] : vector<128x128xf32> to vector<128xf32>
    %8 = vector.shape_cast %7 : vector<128xf32> to vector<1x128xf32>
    %9 = tpu.concatenate %5, %8 in 0 : vector<1x128xf32>, vector<1x128xf32> -> vector<2x128xf32>
    %10 = vector.shape_cast %9 : vector<2x128xf32> to vector<1x2x128xf32>
    %c0_7 = arith.constant 0 : index
    %c0_8 = arith.constant 0 : index
    %c0_9 = arith.constant 0 : index
    %11 = vector.load %arg4[%c0_7, %c0_8, %c0_9] : memref<1x2x128xf32, #tpu.memory_space<vmem>>, vector<1x2x128xf32>
    tpu.vector_store %arg4[%c0_7, %c0_8, %c0_9], %10 {strides = array<i32>} : memref<1x2x128xf32, #tpu.memory_space<vmem>>, vector<1x2x128xf32>,
    return
  }
  func.func @transform_0(%arg0: i32) -> (i32, i32) {
    %c0_i32 = arith.constant 0 : i32
    %c0_i32_0 = arith.constant 0 : i32
    return %arg0, %c0_i32 : i32, i32
  }
  func.func @transform_1(%arg0: i32) -> (i32, i32) {
    %c0_i32 = arith.constant 0 : i32
    %c0_i32_0 = arith.constant 0 : i32
    %c0_i32_1 = arith.constant 0 : i32
    return %c0_i32, %c0_i32_0 : i32, i32
  }
  func.func @transform_2(%arg0: i32) -> (i32, i32) {
    %c0_i32 = arith.constant 0 : i32
    %c0_i32_0 = arith.constant 0 : i32
    return %arg0, %c0_i32 : i32, i32
  }
  func.func @transform_3(%arg0: i32) -> (i32, i32, i32) {
    %c0_i32 = arith.constant 0 : i32
    %c0_i32_0 = arith.constant 0 : i32
    %c0_i32_1 = arith.constant 0 : i32
    return %arg0, %c0_i32, %c0_i32_0 : i32, i32, i32
  }
}

module attributes {stable_mosaic.version = 11 : i64} {
  func.func @_bn_relu_cfirst_kernel(%arg0: i32, %arg1: memref<128x128xf32, #tpu.memory_space<vmem>>, %arg2: memref<1x128xf32, #tpu.memory_space<vmem>>, %arg3: memref<1x128xf32, #tpu.memory_space<vmem>>, %arg4: memref<8x128xf32, #tpu.memory_space<vmem>>) attributes {dimension_semantics = [#tpu.dimension_semantics<parallel>], iteration_bounds = array<i64: 4>, scalar_prefetch = 0 : i64, scratch_operands = 0 : i64, tpu.core_type = #tpu.core_type<tc>, window_params = [{transform_indices = @transform_0, window_bounds = array<i64: 128, 128>}, {pipeline_mode = #tpu.pipeline_mode<synchronous>, transform_indices = @transform_1, window_bounds = array<i64: 1, 128>}, {pipeline_mode = #tpu.pipeline_mode<synchronous>, transform_indices = @transform_2, window_bounds = array<i64: 1, 128>}, {transform_indices = @transform_3, window_bounds = array<i64: 8, 128>}]} {
    %c0 = arith.constant 0 : index
    %c0_0 = arith.constant 0 : index
    %0 = vector.load %arg1[%c0, %c0_0] : memref<128x128xf32, #tpu.memory_space<vmem>>, vector<128x128xf32>
    %c0_1 = arith.constant 0 : index
    %c0_2 = arith.constant 0 : index
    %1 = vector.load %arg2[%c0_1, %c0_2] : memref<1x128xf32, #tpu.memory_space<vmem>>, vector<1x128xf32>
    %2 = vector.broadcast %1 : vector<1x128xf32> to vector<128x128xf32>
    %3 = arith.mulf %0, %2 : vector<128x128xf32>
    %c0_3 = arith.constant 0 : index
    %c0_4 = arith.constant 0 : index
    %4 = vector.load %arg3[%c0_3, %c0_4] : memref<1x128xf32, #tpu.memory_space<vmem>>, vector<1x128xf32>
    %5 = vector.broadcast %4 : vector<1x128xf32> to vector<128x128xf32>
    %6 = arith.addf %3, %5 : vector<128x128xf32>
    %cst = arith.constant 0.000000e+00 : f32
    %7 = vector.broadcast %cst : f32 to vector<128x128xf32>
    %8 = arith.maximumf %6, %7 : vector<128x128xf32>
    %9 = tpu.transpose %8, [1, 0] : vector<128x128xf32> -> vector<128x128xf32>
    %10 = vector.extract_strided_slice %9 {offsets = [0, 0], sizes = [8, 128], strides = [1, 1]} : vector<128x128xf32> to vector<8x128xf32>
    %c0_5 = arith.constant 0 : index
    %c0_6 = arith.constant 0 : index
    %11 = vector.load %arg4[%c0_5, %c0_6] : memref<8x128xf32, #tpu.memory_space<vmem>>, vector<8x128xf32>
    tpu.vector_store %arg4[%c0_5, %c0_6], %10 {strides = array<i32>} : memref<8x128xf32, #tpu.memory_space<vmem>>, vector<8x128xf32>,
    return
  }
  func.func @transform_0(%arg0: i32) -> (i32, i32) {
    %c0_i32 = arith.constant 0 : i32
    %c0_i32_0 = arith.constant 0 : i32
    return %arg0, %c0_i32 : i32, i32
  }
  func.func @transform_1(%arg0: i32) -> (i32, i32) {
    %c0_i32 = arith.constant 0 : i32
    %c0_i32_0 = arith.constant 0 : i32
    %c0_i32_1 = arith.constant 0 : i32
    return %c0_i32, %c0_i32_0 : i32, i32
  }
  func.func @transform_2(%arg0: i32) -> (i32, i32) {
    %c0_i32 = arith.constant 0 : i32
    %c0_i32_0 = arith.constant 0 : i32
    %c0_i32_1 = arith.constant 0 : i32
    return %c0_i32, %c0_i32_0 : i32, i32
  }
  func.func @transform_3(%arg0: i32) -> (i32, i32) {
    %c0_i32 = arith.constant 0 : i32
    %c0_i32_0 = arith.constant 0 : i32
    return %c0_i32, %arg0 : i32, i32
  }
}

</mosaic_0001>

<bundles_post_ra>
// kernel: double_conv.5
= control target key start
LH: loop header
LB: loop body
LE: loop exit
PB: predicated region body
PF: predicated region fallthrough
CT: control target
= control target key end

     0   :  { %s373_s12 = smov 0   ;;  %s468_s0 = inlined_call_operand.vmem [shape: f32[512,128], index: 0, kind: input, shape index: {}]   ;;  %s469_s1 = inlined_call_operand.vmem [shape: f32[1,128], index: 1, kind: input, shape index: {}]   ;;  %s470_s2 = inlined_call_operand.vmem [shape: f32[1,128], index: 2, kind: input, shape index: {}]   ;;  %s471_s3 = inlined_call_operand.vmem [shape: f32[512,128], index: 3, kind: output, shape index: {}]  }
   0x1 LB: > { %s324_s13 = sadd.s32 4294967295, %s351_s12   ;;  %p328_p0 = scmp.ge.s32.totalorder %s351_s12, 1  ;;  %s351_s12 = sphi %s373_s12, %s13_s12  }
   0x2   : > { %p138_p1 = scmp.lt.s32.totalorder %s351_s12, 5 }
   0x4   : > { %p139_p2 = pnand %p328_p0, %p138_p1 }
   0x5   : > { %s329_s14 = sshll.u32 (!%p139_p2), %s324_s13, 4 }
   0x6   : > { %142 = sbr.rel (%p139_p2) target bundleno = 32 (0x20), region = 32  ;;  %p163_p3 = scmp.lt.s32.totalorder (!%p139_p2), %s329_s14, 63 }
   0xb   : > { %s473_s14 = smov (!%p163_p3, %s329_s14), 63  ;;  %v384_v0 = vld [vmem:[%s469_s1] ss:$0 sm:$0xff] }
   0xc   : > { %s330_s15 = sshll.u32 %s473_s14, 3  ;;  %v394_v1 = vld [vmem:[%s470_s2] ss:$0 sm:$0xff] }
   0xd   : > { %s389_s20 = scalar_lea.vmem %s468_s0, %s330_s15  ;;  %s417_s25 = scalar_lea.vmem %s471_s3, %s330_s15 }
   0xe   : > { %v174_v2 = vld [vmem:[%s389_s20] sm:$0xff]  ;;  %v175_v3 = vld [vmem:[%s389_s20 + $0x8] sm:$0xff]  ;;  %v176_v4 = vld [vmem:[%s389_s20 + $0x10] sm:$0xff] }
   0xf   : > { %v197_v5 = vmul.f32 %v384_v0, %v174_v2  ;;  %v198_v6 = vmul.f32 %v384_v0, %v175_v3  ;;  %v199_v7 = vmul.f32 %v384_v0, %v176_v4  ;;  %v177_v8 = vld [vmem:[%s389_s20 + $0x18] sm:$0xff]  ;;  %v178_v9 = vld [vmem:[%s389_s20 + $0x20] sm:$0xff]  ;;  %v179_v10 = vld [vmem:[%s389_s20 + $0x28] sm:$0xff] }
  0x10   : > { %v200_v11 = vmul.f32 %v384_v0, %v177_v8  ;;  %v201_v12 = vmul.f32 %v384_v0, %v178_v9  ;;  %v202_v13 = vmul.f32 %v384_v0, %v179_v10  ;;  %v180_v14 = vld [vmem:[%s389_s20 + $0x30] sm:$0xff]  ;;  %v181_v15 = vld [vmem:[%s389_s20 + $0x38] sm:$0xff]  ;;  %v182_v24 = vld [vmem:[%s389_s20 + $0x40] sm:$0xff] }
  0x11   : > { %v220_v16 = vadd.f32 %v394_v1, %v197_v5  ;;  %v221_v17 = vadd.f32 %v394_v1, %v198_v6  ;;  %v222_v18 = vadd.f32 %v394_v1, %v199_v7  ;;  %v203_v19 = vmul.f32 %v384_v0, %v180_v14  ;;  %v183_v25 = vld [vmem:[%s389_s20 + $0x48] sm:$0xff]  ;;  %v184_v26 = vld [vmem:[%s389_s20 + $0x50] sm:$0xff]  ;;  %v185_v31 = vld [vmem:[%s389_s20 + $0x58] sm:$0xff] }
  0x12   : > { %v223_v20 = vadd.f32 %v394_v1, %v200_v11  ;;  %v224_v21 = vadd.f32 %v394_v1, %v201_v12  ;;  %v225_v22 = vadd.f32 %v394_v1, %v202_v13  ;;  %v204_v23 = vmul.f32 %v384_v0, %v181_v15  ;;  %v186_v32 = vld [vmem:[%s389_s20 + $0x60] sm:$0xff]  ;;  %v187_v33 = vld [vmem:[%s389_s20 + $0x68] sm:$0xff]  ;;  %v188_v38 = vld [vmem:[%s389_s20 + $0x70] sm:$0xff] }
  0x13   : > { %v236_v27 = vmax.f32 %v220_v16, 0.0  ;;  %v237_v28 = vmax.f32 %v221_v17, 0.0  ;;  %v238_v29 = vmax.f32 %v222_v18, 0.0  ;;  %v226_v30 = vadd.f32 %v394_v1, %v203_v19  ;;  %v189_v43 = vld [vmem:[%s389_s20 + $0x78] sm:$0xff] }
  0x14   : > { %v239_v34 = vmax.f32 %v223_v20, 0.0  ;;  %v240_v35 = vmax.f32 %v224_v21, 0.0  ;;  %v241_v36 = vmax.f32 %v225_v22, 0.0  ;;  %v227_v37 = vadd.f32 %v394_v1, %v204_v23 }
  0x15   : > { %252 = vst [vmem:[%s417_s25] sm:$0xff] %v236_v27  ;;  %253 = vst [vmem:[%s417_s25 + $0x8] sm:$0xff] %v237_v28  ;;  %v242_v39 = vmax.f32 %v226_v30, 0.0  ;;  %v205_v40 = vmul.f32 %v384_v0, %v182_v24  ;;  %v206_v41 = vmul.f32 %v384_v0, %v183_v25  ;;  %v207_v42 = vmul.f32 %v384_v0, %v184_v26 }
  0x16   : > { %254 = vst [vmem:[%s417_s25 + $0x10] sm:$0xff] %v238_v29  ;;  %255 = vst [vmem:[%s417_s25 + $0x18] sm:$0xff] %v239_v34  ;;  %v243_v44 = vmax.f32 %v227_v37, 0.0  ;;  %v208_v45 = vmul.f32 %v384_v0, %v185_v31  ;;  %v209_v46 = vmul.f32 %v384_v0, %v186_v32  ;;  %v210_v47 = vmul.f32 %v384_v0, %v187_v33 }
  0x17   : > { %256 = vst [vmem:[%s417_s25 + $0x20] sm:$0xff] %v240_v35  ;;  %257 = vst [vmem:[%s417_s25 + $0x28] sm:$0xff] %v241_v36  ;;  %v228_v48 = vadd.f32 %v394_v1, %v205_v40  ;;  %v229_v49 = vadd.f32 %v394_v1, %v206_v41  ;;  %v230_v50 = vadd.f32 %v394_v1, %v207_v42 }
  0x18   : > { %258 = vst [vmem:[%s417_s25 + $0x30] sm:$0xff] %v242_v39  ;;  %v211_v51 = vmul.f32 %v384_v0, %v188_v38  ;;  %259 = vst [vmem:[%s417_s25 + $0x38] sm:$0xff] %v243_v44  ;;  %v231_v52 = vadd.f32 %v394_v1, %v208_v45  ;;  %v232_v53 = vadd.f32 %v394_v1, %v209_v46 }
  0x19   : > { %v233_v54 = vadd.f32 %v394_v1, %v210_v47  ;;  %v212_v55 = vmul.f32 %v384_v0, %v189_v43  ;;  %v244_v56 = vmax.f32 %v228_v48, 0.0  ;;  %v245_v57 = vmax.f32 %v229_v49, 0.0 }
  0x1a   : > { %v246_v58 = vmax.f32 %v230_v50, 0.0  ;;  %v234_v59 = vadd.f32 %v394_v1, %v211_v51  ;;  %v247_v60 = vmax.f32 %v231_v52, 0.0  ;;  %v248_v61 = vmax.f32 %v232_v53, 0.0 }
  0x1b   : > { %v249_v62 = vmax.f32 %v233_v54, 0.0  ;;  %v235_v63 = vadd.f32 %v394_v1, %v212_v55  ;;  %260 = vst [vmem:[%s417_s25 + $0x40] sm:$0xff] %v244_v56  ;;  %261 = vst [vmem:[%s417_s25 + $0x48] sm:$0xff] %v245_v57 }
  0x1c   : > { %262 = vst [vmem:[%s417_s25 + $0x50] sm:$0xff] %v246_v58  ;;  %v250_v2 = vmax.f32 %v234_v59, 0.0  ;;  %263 = vst [vmem:[%s417_s25 + $0x58] sm:$0xff] %v247_v60 }
  0x1d   : > { %264 = vst [vmem:[%s417_s25 + $0x60] sm:$0xff] %v248_v61  ;;  %265 = vst [vmem:[%s417_s25 + $0x68] sm:$0xff] %v249_v62  ;;  %v251_v0 = vmax.f32 %v235_v63, 0.0 }
  0x1e   : > { %266 = vst [vmem:[%s417_s25 + $0x70] sm:$0xff] %v250_v2 }
  0x1f   : > { %267 = vst [vmem:[%s417_s25 + $0x78] sm:$0xff] %v251_v0 }
  0x20 PF: > { %s13_s12 = sadd.s32 1, %s351_s12  }
  0x21   : > { %p10_p4 = scmp.ge.s32.totalorder %s13_s12, 6  }
  0x23   :  { %12 = sbr.rel (!%p10_p4) target bundleno = 1 (0x1), region = 62 }

// kernel: double_conv.4
= control target key start
LH: loop header
LB: loop body
LE: loop exit
PB: predicated region body
PF: predicated region fallthrough
CT: control target
= control target key end

     0   :  { %s698_s12 = smov 0   ;;  %s797_s0 = inlined_call_operand.vmem [shape: f32[512,36], index: 0, kind: input, shape index: {}]   ;;  %s798_s1 = inlined_call_operand.vmem [shape: f32[36,128], index: 1, kind: input, shape index: {}]   ;;  %s799_s2 = inlined_call_operand.vmem [shape: f32[512,128], index: 2, kind: output, shape index: {0}]   ;;  %s800_s3 = inlined_call_operand.vmem [shape: f32[4,2,128], index: 3, kind: output, shape index: {1}]  }
   0x1 LB: > { %s704_s13 = sadd.s32 4294967295, %s676_s12   ;;  %p572_p0 = scmp.ge.s32.totalorder %s676_s12, 1  ;;  %s676_s12 = sphi %s698_s12, %s14_s12  }
   0x2   : > { %p141_p1 = scmp.lt.s32.totalorder %s676_s12, 5 }
   0x4   : > { %p142_p2 = pnand %p572_p0, %p141_p1 }
   0x5   : > { %s573_s18 = sshll.u32 (!%p142_p2), %s704_s13, 4  ;;  %p181_p4 = scmp.lt.s32.totalorder (!%p142_p2), %s704_s13, 3 }
   0x6   : > { %145 = sbr.rel (%p142_p2) target bundleno = 265 (0x109), region = 28  ;;  %p170_p3 = scmp.lt.s32.totalorder (!%p142_p2), %s573_s18, 63 }
   0xb   : > { %v205_v0 = vld [vmem:[%s798_s1 + $0x20] sm:$0xf]  ;;  %vm255_vm0 = vcmask 1043456   ;;  %v204_v1 = vld [vmem:[%s798_s1 + $0x18] sm:$0xff]  ;;  %v203_v2 = vld [vmem:[%s798_s1 + $0x10] sm:$0xff]  ;;  %s802_s18 = smov (!%p170_p3, %s573_s18), 63 }
   0xc   : > { %618 = vmatprep.subr.msk.mxu0 %vm255_vm0, %v205_v0  ;;  %652 = vmatprep.subr.msk.mxu1 %vm255_vm0, %v205_v0  ;;  %v202_v3 = vld [vmem:[%s798_s1 + $0x8] sm:$0xff]  ;;  %s574_s23 = sshll.u32 %s802_s18, 3  ;;  %vm206_vm1 = vcmask 293888   ;;  %v201_v4 = vld [vmem:[%s798_s1] sm:$0xff]  ;;  %s804_s13 = smov (!%p181_p4, %s704_s13), 3  ;;  %vm478_vm2 = vcmask 1040384  }
   0xd   : > { %619 = vmatpush3.msk.msra.mxu0 %vm255_vm0, %v205_v0  ;;  %657 = vmatpush3.msk.msra.mxu1 %vm255_vm0, %v205_v0  ;;  %s732_s28 = scalar_lea.vmem %s797_s0, %s574_s23  ;;  %s771_s4 = scalar_lea.vmem %s799_s2, %s574_s23 }
   0xe   : > { %620 = vmatprep.subr.mxu0 %v204_v1  ;;  %653 = vmatprep.subr.mxu1 %v204_v1  ;;  %v185_v5 = vld [vmem:[%s732_s28] sm:$0xff]  ;;  %v186_v6 = vld [vmem:[%s732_s28 + $0x8] sm:$0xff]  ;;  %v187_v7 = vld [vmem:[%s732_s28 + $0x10] sm:$0xff]  ;;  %s577_s5 = sshll.u32 %s804_s13, 1 }
   0xf   : > { %621 = vmatpush3.msra.mxu0 %v204_v1  ;;  %658 = vmatpush3.msra.mxu1 %v204_v1  ;;  %v193_v8 = vld [vmem:[%s732_s28 + $0x40] sm:$0xff]  ;;  %v194_v9 = vld [vmem:[%s732_s28 + $0x48] sm:$0xff]  ;;  %v195_v10 = vld [vmem:[%s732_s28 + $0x50] sm:$0xff]  ;;  %s184_s8 = scalar_lea.vmem %s800_s3, %s577_s5 }
  0x10   : > { %622 = vmatprep.subr.mxu0 %v203_v2  ;;  %654 = vmatprep.subr.mxu1 %v203_v2  ;;  %v188_v11 = vld [vmem:[%s732_s28 + $0x18] sm:$0xff]  ;;  %v189_v12 = vld [vmem:[%s732_s28 + $0x20] sm:$0xff]  ;;  %v190_v15 = vld [vmem:[%s732_s28 + $0x28] sm:$0xff] }
  0x11   : > { %623 = vmatpush3.msra.mxu0 %v203_v2  ;;  %659 = vmatpush3.msra.mxu1 %v203_v2  ;;  %v196_v13 = vld [vmem:[%s732_s28 + $0x58] sm:$0xff]  ;;  %v197_v14 = vld [vmem:[%s732_s28 + $0x60] sm:$0xff]  ;;  %v191_v16 = vld [vmem:[%s732_s28 + $0x30] sm:$0xff] }
  0x12   : > { %624 = vmatprep.subr.mxu0 %v202_v3  ;;  %655 = vmatprep.subr.mxu1 %v202_v3  ;;  %v198_v17 = vld [vmem:[%s732_s28 + $0x68] sm:$0xff]  ;;  %v199_v18 = vld [vmem:[%s732_s28 + $0x70] sm:$0xff]  ;;  %v192_v19 = vld [vmem:[%s732_s28 + $0x38] sm:$0xff] }
  0x13   : > { %625 = vmatpush3.msra.mxu0 %v202_v3  ;;  %628 = vmatprep.mubr.msk.f32.mxu0 %vm206_vm1, %v185_v5  ;;  %v200_v20 = vld [vmem:[%s732_s28 + $0x78] sm:$0xff] }
  0x14   : > { %626 = vmatprep.subr.mxu0 %v201_v4  ;;  %660 = vmatpush3.msra.mxu1 %v202_v3 }
  0x15   : > { %627 = vmatpush3.msra.mxu0 %v201_v4  ;;  %656 = vmatprep.subr.mxu1 %v201_v4 }
  0x16   : > { %629 = vmatmul.mubr.msk.f32.vlgmr.msra.gmra.mxu0 %vm206_vm1, %v186_v6  ;;  %661 = vmatpush3.msra.mxu1 %v201_v4 }
  0x17   : > { %631 = vmatprep.mubr.msk.f32.mxu0 %vm206_vm1, %v187_v7  ;;  %640 = vmatprep.mubr.msk.f32.mxu1 %vm206_vm1, %v193_v8 }
  0x18   : > { %641 = vmatmul.mubr.msk.f32.vlgmr.msra.gmra.mxu1 %vm206_vm1, %v194_v9 }
  0x19   : > { %643 = vmatprep.mubr.msk.f32.mxu1 %vm206_vm1, %v195_v10 }
  0x1a   : > { %632 = vmatmul.mubr.msk.f32.gmra.mxu0 %vm206_vm1, %v188_v11 }
  0x1b   : > { %634 = vmatprep.mubr.msk.f32.mxu0 %vm206_vm1, %v189_v12 }
  0x1c   : > { %644 = vmatmul.mubr.msk.f32.gmra.mxu1 %vm206_vm1, %v196_v13 }
  0x1d   : > { %646 = vmatprep.mubr.msk.f32.mxu1 %vm206_vm1, %v197_v14 }
  0x1e   : > { %635 = vmatmul.mubr.msk.f32.gmra.mxu0 %vm206_vm1, %v190_v15 }
  0x1f   : > { %637 = vmatprep.mubr.msk.f32.mxu0 %vm206_vm1, %v191_v16 }
  0x20   : > { %647 = vmatmul.mubr.msk.f32.gmra.mxu1 %vm206_vm1, %v198_v17 }
  0x21   : > { %649 = vmatprep.mubr.msk.f32.mxu1 %vm206_vm1, %v199_v18 }
  0x22   : > { %638 = vmatmul.mubr.msk.f32.gmra.mxu0 %vm206_vm1, %v192_v19 }
  0x24   : > { %650 = vmatmul.mubr.msk.f32.gmra.mxu1 %vm206_vm1, %v200_v20 }
  0xd6   : > { %v630_v21 = vpop.f32.mrf.mxu0 }
  0xd7   : > { %405 = vst [vmem:[%s771_s4 + $0x8] sm:$0xff] %v630_v21  ;;  %v442_v27 = vmul.f32 %v630_v21, %v630_v21 }
  0xd8   : > { %v325_v22 = vpop.f32.mrf.mxu0  ;;  %v642_v23 = vpop.f32.mrf.mxu1 }
  0xd9   : > { %404 = vst [vmem:[%s771_s4] sm:$0xff] %v325_v22  ;;  %v441_v24 = vmul.f32 %v325_v22, %v325_v22  ;;  %413 = vst [vmem:[%s771_s4 + $0x48] sm:$0xff] %v642_v23  ;;  %v420_v28 = vadd.f32 %v630_v21, %v325_v22  ;;  %v450_v61 = vmul.f32 %v642_v23, %v642_v23 }
  0xda   : > { %v633_v25 = vpop.f32.mrf.mxu0  ;;  %v365_v26 = vpop.f32.mrf.mxu1 }
  0xdb   : > { %407 = vst [vmem:[%s771_s4 + $0x18] sm:$0xff] %v633_v25  ;;  %412 = vst [vmem:[%s771_s4 + $0x40] sm:$0xff] %v365_v26  ;;  %v457_v31 = vadd.f32 %v442_v27, %v441_v24  ;;  %v444_v36 = vmul.f32 %v633_v25, %v633_v25  ;;  %v449_v60 = vmul.f32 %v365_v26, %v365_v26 }
  0xdc   : > { %v335_v29 = vpop.f32.mrf.mxu0  ;;  %v645_v30 = vpop.f32.mrf.mxu1 }
  0xdd   : > { %406 = vst [vmem:[%s771_s4 + $0x10] sm:$0xff] %v335_v29  ;;  %v421_v32 = vadd.f32 %v420_v28, %v335_v29  ;;  %v443_v33 = vmul.f32 %v335_v29, %v335_v29  ;;  %415 = vst [vmem:[%s771_s4 + $0x58] sm:$0xff] %v645_v30  ;;  %v452_v3 = vmul.f32 %v645_v30, %v645_v30 }
  0xde   : > { %v636_v34 = vpop.f32.mrf.mxu0  ;;  %v375_v35 = vpop.f32.mrf.mxu1 }
  0xdf   : > { %v458_v37 = vadd.f32 %v457_v31, %v443_v33  ;;  %409 = vst [vmem:[%s771_s4 + $0x28] sm:$0xff] %v636_v34  ;;  %v422_v38 = vadd.f32 %v633_v25, %v421_v32  ;;  %414 = vst [vmem:[%s771_s4 + $0x50] sm:$0xff] %v375_v35  ;;  %v446_v46 = vmul.f32 %v636_v34, %v636_v34 }
  0xe0   : > { %v345_v39 = vpop.f32.mrf.mxu0  ;;  %v648_v40 = vpop.f32.mrf.mxu1  ;;  %v451_v1 = vmul.f32 %v375_v35, %v375_v35 }
  0xe1   : > { %408 = vst [vmem:[%s771_s4 + $0x20] sm:$0xff] %v345_v39  ;;  %v423_v41 = vadd.f32 %v422_v38, %v345_v39  ;;  %v445_v42 = vmul.f32 %v345_v39, %v345_v39  ;;  %v459_v43 = vadd.f32 %v458_v37, %v444_v36  ;;  %417 = vst [vmem:[%s771_s4 + $0x68] sm:$0xff] %v648_v40 }
  0xe2   : > { %v639_v44 = vpop.f32.mrf.mxu0  ;;  %v385_v45 = vpop.f32.mrf.mxu1  ;;  %v454_v9 = vmul.f32 %v648_v40, %v648_v40 }
  0xe3   : > { %v460_v47 = vadd.f32 %v459_v43, %v445_v42  ;;  %411 = vst [vmem:[%s771_s4 + $0x38] sm:$0xff] %v639_v44  ;;  %v424_v48 = vadd.f32 %v636_v34, %v423_v41  ;;  %416 = vst [vmem:[%s771_s4 + $0x60] sm:$0xff] %v385_v45  ;;  %v448_v55 = vmul.f32 %v639_v44, %v639_v44 }
  0xe4   : > { %v355_v49 = vpop.f32.mrf.mxu0  ;;  %v651_v50 = vpop.f32.mrf.mxu1  ;;  %v453_v7 = vmul.f32 %v385_v45, %v385_v45 }
  0xe5   : > { %410 = vst [vmem:[%s771_s4 + $0x30] sm:$0xff] %v355_v49  ;;  %v425_v51 = vadd.f32 %v424_v48, %v355_v49  ;;  %v447_v52 = vmul.f32 %v355_v49, %v355_v49  ;;  %v461_v53 = vadd.f32 %v460_v47, %v446_v46  ;;  %419 = vst [vmem:[%s771_s4 + $0x78] sm:$0xff] %v651_v50 }
  0xe6   : > { %v395_v54 = vpop.f32.mrf.mxu1  ;;  %v456_v15 = vmul.f32 %v651_v50, %v651_v50 }
  0xe7   : > { %v426_v56 = vadd.f32 %v639_v44, %v425_v51  ;;  %v462_v57 = vadd.f32 %v461_v53, %v447_v52  ;;  %418 = vst [vmem:[%s771_s4 + $0x70] sm:$0xff] %v395_v54  ;;  %v455_v13 = vmul.f32 %v395_v54, %v395_v54 }
  0xe9   : > { %v463_v58 = vadd.f32 %v462_v57, %v448_v55  ;;  %v427_v59 = vadd.f32 %v426_v56, %v365_v26 }
  0xeb   : > { %v464_v62 = vadd.f32 %v463_v58, %v449_v60  ;;  %v428_v63 = vadd.f32 %v642_v23, %v427_v59 }
  0xed   : > { %v429_v0 = vadd.f32 %v428_v63, %v375_v35  ;;  %v465_v2 = vadd.f32 %v464_v62, %v450_v61 }
  0xef   : > { %v466_v4 = vadd.f32 %v465_v2, %v451_v1  ;;  %v430_v5 = vadd.f32 %v645_v30, %v429_v0 }
  0xf1   : > { %v431_v6 = vadd.f32 %v430_v5, %v385_v45  ;;  %v467_v8 = vadd.f32 %v466_v4, %v452_v3 }
  0xf3   : > { %v468_v10 = vadd.f32 %v467_v8, %v453_v7  ;;  %v432_v11 = vadd.f32 %v648_v40, %v431_v6 }
  0xf5   : > { %v433_v12 = vadd.f32 %v432_v11, %v395_v54  ;;  %v469_v14 = vadd.f32 %v468_v10, %v454_v9 }
  0xf7   : > { %v434_v16 = vadd.f32 %v651_v50, %v433_v12  ;;  %v470_v17 = vadd.f32 %v469_v14, %v455_v13 }
  0xf9   : > { %v435_v18 = vrot.slane %v434_v16, 4  ;;  %v471_v19 = vadd.f32 %v470_v17, %v456_v15 }
  0xfb   : > { %v436_v20 = vadd.f32 %v435_v18, %v434_v16  ;;  %v472_v21 = vrot.slane %v471_v19, 4 }
  0xfd   : > { %v437_v22 = vrot.slane %v436_v20, 2  ;;  %v473_v23 = vadd.f32 %v472_v21, %v471_v19 }
  0xff   : > { %v438_v24 = vadd.f32 %v437_v22, %v436_v20  ;;  %v474_v25 = vrot.slane %v473_v23, 2 }
 0x101   : > { %v439_v26 = vrot.slane %v438_v24, 1  ;;  %v475_v27 = vadd.f32 %v474_v25, %v473_v23 }
 0x103   : > { %v476_v28 = vrot.slane %v475_v27, 1  ;;  %v440_v29 = vadd.f32 %v439_v26, %v438_v24 }
 0x105   : > { %v477_v30 = vadd.f32 %v476_v28, %v475_v27 }
 0x107   : > { %v479_v31 = vsel %vm478_vm2, %v440_v29, %v477_v30 }
 0x108   : > { %480 = vst [vmem:[%s184_s8] sm:$0x3] %v479_v31 }
 0x109 PF: > { %s14_s12 = sadd.s32 1, %s676_s12  }
 0x10a   : > { %p11_p5 = scmp.ge.s32.totalorder %s14_s12, 6  }
 0x10c   :  { %13 = sbr.rel (!%p11_p5) target bundleno = 1 (0x1), region = 70 }

// kernel: double_conv.7
= control target key start
LH: loop header
LB: loop body
LE: loop exit
PB: predicated region body
PF: predicated region fallthrough
CT: control target
= control target key end

     0   :  { %s383_s12 = smov 0   ;;  %s465_s0 = inlined_call_operand.vmem [shape: f32[512,128], index: 0, kind: input, shape index: {}]   ;;  %s466_s1 = inlined_call_operand.vmem [shape: f32[1,128], index: 1, kind: input, shape index: {}]   ;;  %s467_s2 = inlined_call_operand.vmem [shape: f32[1,128], index: 2, kind: input, shape index: {}]   ;;  %s468_s3 = inlined_call_operand.vmem [shape: f32[8,512], index: 3, kind: output, shape index: {}]  }
   0x1 LB: > { %s389_s13 = sadd.s32 4294967295, %s361_s12   ;;  %p339_p0 = scmp.ge.s32.totalorder %s361_s12, 1  ;;  %s361_s12 = sphi %s383_s12, %s13_s12  }
   0x2   : > { %p138_p1 = scmp.lt.s32.totalorder %s361_s12, 5 }
   0x4   : > { %p139_p2 = pnand %p339_p0, %p138_p1 }
   0x5   : > { %s340_s14 = sshll.u32 (!%p139_p2), %s389_s13, 4  ;;  %p167_p4 = scmp.lt.s32.totalorder (!%p139_p2), %s389_s13, 3 }
   0x6   : > { %142 = sbr.rel (%p139_p2) target bundleno = 147 (0x93), region = 32  ;;  %p162_p3 = scmp.lt.s32.totalorder (!%p139_p2), %s340_s14, 63 }
   0xb   : > { %s470_s14 = smov (!%p162_p3, %s340_s14), 63  ;;  %v397_v0 = vld [vmem:[%s466_s1] ss:$0 sm:$0xff]  ;;  %s472_s13 = smov (!%p167_p4, %s389_s13), 3 }
   0xc   : > { %s341_s15 = sshll.u32 %s470_s14, 3  ;;  %v407_v1 = vld [vmem:[%s467_s2] ss:$0 sm:$0xff]  ;;  %s342_s23 = sshll.u32 %s472_s13, 3 }
   0xd   : > { %s402_s20 = scalar_lea.vmem %s465_s0, %s341_s15  ;;  %s170_s26 = scalar_lea.vmem %s468_s3, %s342_s23 }
   0xe   : > { %v171_v2 = vld [vmem:[%s402_s20] sm:$0xff]  ;;  %v172_v3 = vld [vmem:[%s402_s20 + $0x8] sm:$0xff]  ;;  %v173_v4 = vld [vmem:[%s402_s20 + $0x10] sm:$0xff] }
   0xf   : > { %v194_v5 = vmul.f32 %v397_v0, %v171_v2  ;;  %v195_v6 = vmul.f32 %v397_v0, %v172_v3  ;;  %v196_v9 = vmul.f32 %v397_v0, %v173_v4  ;;  %v174_v10 = vld [vmem:[%s402_s20 + $0x18] sm:$0xff]  ;;  %v175_v15 = vld [vmem:[%s402_s20 + $0x20] sm:$0xff]  ;;  %v176_v19 = vld [vmem:[%s402_s20 + $0x28] sm:$0xff] }
  0x10   : > { %v197_v14 = vmul.f32 %v397_v0, %v174_v10  ;;  %v198_v18 = vmul.f32 %v397_v0, %v175_v15  ;;  %v199_v22 = vmul.f32 %v397_v0, %v176_v19  ;;  %v177_v23 = vld [vmem:[%s402_s20 + $0x30] sm:$0xff]  ;;  %v178_v27 = vld [vmem:[%s402_s20 + $0x38] sm:$0xff]  ;;  %v179_v31 = vld [vmem:[%s402_s20 + $0x40] sm:$0xff] }
  0x11   : > { %v217_v7 = vadd.f32 %v407_v1, %v194_v5  ;;  %v218_v8 = vadd.f32 %v407_v1, %v195_v6  ;;  %v219_v13 = vadd.f32 %v407_v1, %v196_v9  ;;  %v200_v26 = vmul.f32 %v397_v0, %v177_v23  ;;  %v180_v35 = vld [vmem:[%s402_s20 + $0x48] sm:$0xff]  ;;  %v181_v39 = vld [vmem:[%s402_s20 + $0x50] sm:$0xff]  ;;  %v182_v43 = vld [vmem:[%s402_s20 + $0x58] sm:$0xff] }
  0x12   : > { %v220_v17 = vadd.f32 %v407_v1, %v197_v14  ;;  %v221_v21 = vadd.f32 %v407_v1, %v198_v18  ;;  %v222_v25 = vadd.f32 %v407_v1, %v199_v22  ;;  %v201_v30 = vmul.f32 %v397_v0, %v178_v27  ;;  %v183_v47 = vld [vmem:[%s402_s20 + $0x60] sm:$0xff]  ;;  %v184_v51 = vld [vmem:[%s402_s20 + $0x68] sm:$0xff]  ;;  %v185_v55 = vld [vmem:[%s402_s20 + $0x70] sm:$0xff] }
  0x13   : > { %v233_v11 = vmax.f32 %v217_v7, 0.0  ;;  %v234_v12 = vmax.f32 %v218_v8, 0.0  ;;  %v235_v16 = vmax.f32 %v219_v13, 0.0  ;;  %v223_v29 = vadd.f32 %v407_v1, %v200_v26  ;;  %v186_v59 = vld [vmem:[%s402_s20 + $0x78] sm:$0xff] }
  0x14   : > { %v236_v20 = vmax.f32 %v220_v17, 0.0  ;;  %v237_v24 = vmax.f32 %v221_v21, 0.0  ;;  %v238_v28 = vmax.f32 %v222_v25, 0.0  ;;  %v224_v33 = vadd.f32 %v407_v1, %v201_v30 }
  0x15   : > { %249 = vxpose.xlu0.b32.start [1/16] (narrow) %v233_v11, 8  ;;  %v239_v32 = vmax.f32 %v223_v29, 0.0  ;;  %v202_v34 = vmul.f32 %v397_v0, %v179_v31  ;;  %v203_v38 = vmul.f32 %v397_v0, %v180_v35  ;;  %v204_v42 = vmul.f32 %v397_v0, %v181_v39 }
  0x16   : > { %v240_v36 = vmax.f32 %v224_v33, 0.0  ;;  %v205_v46 = vmul.f32 %v397_v0, %v182_v43  ;;  %v206_v50 = vmul.f32 %v397_v0, %v183_v47  ;;  %v207_v54 = vmul.f32 %v397_v0, %v184_v51 }
  0x17   : > { %v225_v37 = vadd.f32 %v407_v1, %v202_v34  ;;  %v226_v41 = vadd.f32 %v407_v1, %v203_v38  ;;  %v227_v45 = vadd.f32 %v407_v1, %v204_v42  ;;  %v208_v58 = vmul.f32 %v397_v0, %v185_v55 }
  0x18   : > { %v228_v49 = vadd.f32 %v407_v1, %v205_v46  ;;  %v229_v53 = vadd.f32 %v407_v1, %v206_v50  ;;  %v230_v57 = vadd.f32 %v407_v1, %v207_v54  ;;  %v209_v62 = vmul.f32 %v397_v0, %v186_v59 }
  0x19   : > { %250 = vxpose.xlu0.b32.cont [2/16] (narrow) %v234_v12, 8  ;;  %v241_v40 = vmax.f32 %v225_v37, 0.0  ;;  %v242_v44 = vmax.f32 %v226_v41, 0.0  ;;  %v243_v48 = vmax.f32 %v227_v45, 0.0  ;;  %v231_v61 = vadd.f32 %v407_v1, %v208_v58 }
  0x1a   : > { %v244_v52 = vmax.f32 %v228_v49, 0.0  ;;  %v245_v56 = vmax.f32 %v229_v53, 0.0  ;;  %v246_v60 = vmax.f32 %v230_v57, 0.0  ;;  %v232_v2 = vadd.f32 %v407_v1, %v209_v62 }
  0x1b   : > { %v247_v63 = vmax.f32 %v231_v61, 0.0 }
  0x1c   : > { %v248_v3 = vmax.f32 %v232_v2, 0.0 }
  0x1d   : > { %251 = vxpose.xlu0.b32.cont [3/16] (narrow) %v235_v16, 8 }
  0x21   : > { %252 = vxpose.xlu0.b32.cont [4/16] (narrow) %v236_v20, 8 }
  0x25   : > { %253 = vxpose.xlu0.b32.cont [5/16] (narrow) %v237_v24, 8 }
  0x29   : > { %254 = vxpose.xlu0.b32.cont [6/16] (narrow) %v238_v28, 8 }
  0x2d   : > { %255 = vxpose.xlu0.b32.cont [7/16] (narrow) %v239_v32, 8 }
  0x31   : > { %256 = vxpose.xlu0.b32.cont [8/16] (narrow) %v240_v36, 8 }
  0x35   : > { %257 = vxpose.xlu0.b32.cont [9/16] (narrow) %v241_v40, 8 }
  0x39   : > { %258 = vxpose.xlu0.b32.cont [10/16] (narrow) %v242_v44, 8 }
  0x3d   : > { %259 = vxpose.xlu0.b32.cont [11/16] (narrow) %v243_v48, 8 }
  0x41   : > { %260 = vxpose.xlu0.b32.cont [12/16] (narrow) %v244_v52, 8 }
  0x45   : > { %261 = vxpose.xlu0.b32.cont [13/16] (narrow) %v245_v56, 8 }
  0x49   : > { %262 = vxpose.xlu0.b32.cont [14/16] (narrow) %v246_v60, 8 }
  0x4d   : > { %263 = vxpose.xlu0.b32.cont [15/16] (narrow) %v247_v63, 8 }
  0x51   : > { %264 = vxpose.xlu0.b32.end [16/16] (narrow) %v248_v3, 8 }
  0x91   : > { %v265_v4 = vpop.trf.xlu0 }
  0x92   : > { %281 = vst [vmem:[%s170_s26] sm:$0xff] %v265_v4 }
  0x93 PF: > { %s13_s12 = sadd.s32 1, %s361_s12  }
  0x94   : > { %p10_p5 = scmp.ge.s32.totalorder %s13_s12, 6  }
  0x96   :  { %12 = sbr.rel (!%p10_p5) target bundleno = 1 (0x1), region = 62 }

// kernel: double_conv.6
= control target key start
LH: loop header
LB: loop body
LE: loop exit
PB: predicated region body
PF: predicated region fallthrough
CT: control target
= control target key end

     0   :  { %s717_s12 = smov 0   ;;  %s828_s0 = inlined_call_operand.vmem [shape: f32[512,72], index: 0, kind: input, shape index: {}]   ;;  %s829_s1 = inlined_call_operand.vmem [shape: f32[72,128], index: 1, kind: input, shape index: {}]   ;;  %s830_s2 = inlined_call_operand.vmem [shape: f32[512,128], index: 2, kind: output, shape index: {0}]   ;;  %s831_s3 = inlined_call_operand.vmem [shape: f32[4,2,128], index: 3, kind: output, shape index: {1}]  }
   0x1 LB: > { %s723_s13 = sadd.s32 4294967295, %s695_s12   ;;  %p572_p0 = scmp.ge.s32.totalorder %s695_s12, 1  ;;  %s695_s12 = sphi %s717_s12, %s14_s12  }
   0x2   : > { %p141_p1 = scmp.lt.s32.totalorder %s695_s12, 5 }
   0x4   : > { %p142_p2 = pnand %p572_p0, %p141_p1 }
   0x5   : > { %s573_s18 = sshll.u32 (!%p142_p2), %s723_s13, 4  ;;  %p181_p4 = scmp.lt.s32.totalorder (!%p142_p2), %s723_s13, 3 }
   0x6   : > { %145 = sbr.rel (%p142_p2) target bundleno = 273 (0x111), region = 28  ;;  %p170_p3 = scmp.lt.s32.totalorder (!%p142_p2), %s573_s18, 63 }
   0xb   : > { %v209_v0 = vld [vmem:[%s829_s1 + $0x40] sm:$0xff]  ;;  %v208_v1 = vld [vmem:[%s829_s1 + $0x38] sm:$0xff]  ;;  %v207_v2 = vld [vmem:[%s829_s1 + $0x30] sm:$0xff]  ;;  %s833_s18 = smov (!%p170_p3, %s573_s18), 63  ;;  %vm210_vm0 = vcmask 588800   ;;  %s835_s13 = smov (!%p181_p4, %s723_s13), 3 }
   0xc   : > { %621 = vmatprep.subr.mxu0 %v209_v0  ;;  %663 = vmatprep.subr.mxu1 %v209_v0  ;;  %v206_v3 = vld [vmem:[%s829_s1 + $0x28] sm:$0xff]  ;;  %s574_s23 = sshll.u32 %s833_s18, 3  ;;  %v205_v4 = vld [vmem:[%s829_s1 + $0x20] sm:$0xff]  ;;  %v204_v6 = vld [vmem:[%s829_s1 + $0x18] sm:$0xff]  ;;  %s577_s15 = sshll.u32 %s835_s13, 1  ;;  %vm478_vm1 = vcmask 1040384  }
   0xd   : > { %622 = vmatpush3.msra.mxu0 %v209_v0  ;;  %672 = vmatpush3.msra.mxu1 %v209_v0  ;;  %s751_s28 = scalar_lea.vmem %s828_s0, %s574_s23  ;;  %v203_v7 = vld [vmem:[%s829_s1 + $0x10] sm:$0xff]  ;;  %v202_v8 = vld [vmem:[%s829_s1 + $0x8] sm:$0xff]  ;;  %v201_v9 = vld [vmem:[%s829_s1] sm:$0xff]  ;;  %s802_s14 = scalar_lea.vmem %s830_s2, %s574_s23 }
   0xe   : > { %623 = vmatprep.subr.mxu0 %v208_v1  ;;  %664 = vmatprep.subr.mxu1 %v208_v1  ;;  %v185_v5 = vld [vmem:[%s751_s28] sm:$0xff]  ;;  %v186_v10 = vld [vmem:[%s751_s28 + $0x8] sm:$0xff]  ;;  %v187_v11 = vld [vmem:[%s751_s28 + $0x10] sm:$0xff]  ;;  %s184_s18 = scalar_lea.vmem %s831_s3, %s577_s15 }
   0xf   : > { %624 = vmatpush3.msra.mxu0 %v208_v1  ;;  %673 = vmatpush3.msra.mxu1 %v208_v1  ;;  %v193_v12 = vld [vmem:[%s751_s28 + $0x40] sm:$0xff]  ;;  %v194_v13 = vld [vmem:[%s751_s28 + $0x48] sm:$0xff]  ;;  %v195_v14 = vld [vmem:[%s751_s28 + $0x50] sm:$0xff] }
  0x10   : > { %625 = vmatprep.subr.mxu0 %v207_v2  ;;  %665 = vmatprep.subr.mxu1 %v207_v2  ;;  %v188_v15 = vld [vmem:[%s751_s28 + $0x18] sm:$0xff]  ;;  %v189_v16 = vld [vmem:[%s751_s28 + $0x20] sm:$0xff]  ;;  %v190_v19 = vld [vmem:[%s751_s28 + $0x28] sm:$0xff] }
  0x11   : > { %626 = vmatpush3.msra.mxu0 %v207_v2  ;;  %674 = vmatpush3.msra.mxu1 %v207_v2  ;;  %v196_v17 = vld [vmem:[%s751_s28 + $0x58] sm:$0xff]  ;;  %v197_v18 = vld [vmem:[%s751_s28 + $0x60] sm:$0xff]  ;;  %v191_v20 = vld [vmem:[%s751_s28 + $0x30] sm:$0xff] }
  0x12   : > { %627 = vmatprep.subr.mxu0 %v206_v3  ;;  %666 = vmatprep.subr.mxu1 %v206_v3  ;;  %v198_v21 = vld [vmem:[%s751_s28 + $0x68] sm:$0xff]  ;;  %v199_v22 = vld [vmem:[%s751_s28 + $0x70] sm:$0xff]  ;;  %v192_v23 = vld [vmem:[%s751_s28 + $0x38] sm:$0xff] }
  0x13   : > { %628 = vmatpush3.msra.mxu0 %v206_v3  ;;  %639 = vmatprep.mubr.msk.f32.mxu0 %vm210_vm0, %v185_v5  ;;  %v200_v24 = vld [vmem:[%s751_s28 + $0x78] sm:$0xff] }
  0x14   : > { %629 = vmatprep.subr.mxu0 %v205_v4  ;;  %675 = vmatpush3.msra.mxu1 %v206_v3 }
  0x15   : > { %630 = vmatpush3.msra.mxu0 %v205_v4  ;;  %667 = vmatprep.subr.mxu1 %v205_v4 }
  0x16   : > { %631 = vmatprep.subr.mxu0 %v204_v6  ;;  %676 = vmatpush3.msra.mxu1 %v205_v4 }
  0x17   : > { %632 = vmatpush3.msra.mxu0 %v204_v6  ;;  %668 = vmatprep.subr.mxu1 %v204_v6 }
  0x18   : > { %633 = vmatprep.subr.mxu0 %v203_v7  ;;  %677 = vmatpush3.msra.mxu1 %v204_v6 }
  0x19   : > { %634 = vmatpush3.msra.mxu0 %v203_v7  ;;  %669 = vmatprep.subr.mxu1 %v203_v7 }
  0x1a   : > { %635 = vmatprep.subr.mxu0 %v202_v8  ;;  %678 = vmatpush3.msra.mxu1 %v203_v7 }
  0x1b   : > { %636 = vmatpush3.msra.mxu0 %v202_v8  ;;  %670 = vmatprep.subr.mxu1 %v202_v8 }
  0x1c   : > { %637 = vmatprep.subr.mxu0 %v201_v9  ;;  %679 = vmatpush3.msra.mxu1 %v202_v8 }
  0x1d   : > { %638 = vmatpush3.msra.mxu0 %v201_v9  ;;  %671 = vmatprep.subr.mxu1 %v201_v9 }
  0x1e   : > { %640 = vmatmul.mubr.msk.f32.vlgmr.msra.gmra.mxu0 %vm210_vm0, %v186_v10  ;;  %680 = vmatpush3.msra.mxu1 %v201_v9 }
  0x1f   : > { %642 = vmatprep.mubr.msk.f32.mxu0 %vm210_vm0, %v187_v11  ;;  %651 = vmatprep.mubr.msk.f32.mxu1 %vm210_vm0, %v193_v12 }
  0x20   : > { %652 = vmatmul.mubr.msk.f32.vlgmr.msra.gmra.mxu1 %vm210_vm0, %v194_v13 }
  0x21   : > { %654 = vmatprep.mubr.msk.f32.mxu1 %vm210_vm0, %v195_v14 }
  0x22   : > { %643 = vmatmul.mubr.msk.f32.gmra.mxu0 %vm210_vm0, %v188_v15 }
  0x23   : > { %645 = vmatprep.mubr.msk.f32.mxu0 %vm210_vm0, %v189_v16 }
  0x24   : > { %655 = vmatmul.mubr.msk.f32.gmra.mxu1 %vm210_vm0, %v196_v17 }
  0x25   : > { %657 = vmatprep.mubr.msk.f32.mxu1 %vm210_vm0, %v197_v18 }
  0x26   : > { %646 = vmatmul.mubr.msk.f32.gmra.mxu0 %vm210_vm0, %v190_v19 }
  0x27   : > { %648 = vmatprep.mubr.msk.f32.mxu0 %vm210_vm0, %v191_v20 }
  0x28   : > { %658 = vmatmul.mubr.msk.f32.gmra.mxu1 %vm210_vm0, %v198_v21 }
  0x29   : > { %660 = vmatprep.mubr.msk.f32.mxu1 %vm210_vm0, %v199_v22 }
  0x2a   : > { %649 = vmatmul.mubr.msk.f32.gmra.mxu0 %vm210_vm0, %v192_v23 }
  0x2c   : > { %661 = vmatmul.mubr.msk.f32.gmra.mxu1 %vm210_vm0, %v200_v24 }
  0xde   : > { %v641_v25 = vpop.f32.mrf.mxu0 }
  0xdf   : > { %405 = vst [vmem:[%s802_s14 + $0x8] sm:$0xff] %v641_v25  ;;  %v442_v31 = vmul.f32 %v641_v25, %v641_v25 }
  0xe0   : > { %v325_v26 = vpop.f32.mrf.mxu0  ;;  %v653_v27 = vpop.f32.mrf.mxu1 }
  0xe1   : > { %404 = vst [vmem:[%s802_s14] sm:$0xff] %v325_v26  ;;  %v441_v28 = vmul.f32 %v325_v26, %v325_v26  ;;  %413 = vst [vmem:[%s802_s14 + $0x48] sm:$0xff] %v653_v27  ;;  %v420_v32 = vadd.f32 %v641_v25, %v325_v26  ;;  %v450_v1 = vmul.f32 %v653_v27, %v653_v27 }
  0xe2   : > { %v644_v29 = vpop.f32.mrf.mxu0  ;;  %v365_v30 = vpop.f32.mrf.mxu1 }
  0xe3   : > { %407 = vst [vmem:[%s802_s14 + $0x18] sm:$0xff] %v644_v29  ;;  %412 = vst [vmem:[%s802_s14 + $0x40] sm:$0xff] %v365_v30  ;;  %v457_v35 = vadd.f32 %v442_v31, %v441_v28  ;;  %v444_v40 = vmul.f32 %v644_v29, %v644_v29  ;;  %v449_v0 = vmul.f32 %v365_v30, %v365_v30 }
  0xe4   : > { %v335_v33 = vpop.f32.mrf.mxu0  ;;  %v656_v34 = vpop.f32.mrf.mxu1 }
  0xe5   : > { %406 = vst [vmem:[%s802_s14 + $0x10] sm:$0xff] %v335_v33  ;;  %v421_v36 = vadd.f32 %v420_v32, %v335_v33  ;;  %v443_v37 = vmul.f32 %v335_v33, %v335_v33  ;;  %415 = vst [vmem:[%s802_s14 + $0x58] sm:$0xff] %v656_v34  ;;  %v452_v7 = vmul.f32 %v656_v34, %v656_v34 }
  0xe6   : > { %v647_v38 = vpop.f32.mrf.mxu0  ;;  %v375_v39 = vpop.f32.mrf.mxu1 }
  0xe7   : > { %v458_v41 = vadd.f32 %v457_v35, %v443_v37  ;;  %409 = vst [vmem:[%s802_s14 + $0x28] sm:$0xff] %v647_v38  ;;  %v422_v42 = vadd.f32 %v644_v29, %v421_v36  ;;  %414 = vst [vmem:[%s802_s14 + $0x50] sm:$0xff] %v375_v39  ;;  %v446_v50 = vmul.f32 %v647_v38, %v647_v38 }
  0xe8   : > { %v345_v43 = vpop.f32.mrf.mxu0  ;;  %v659_v44 = vpop.f32.mrf.mxu1  ;;  %v451_v5 = vmul.f32 %v375_v39, %v375_v39 }
  0xe9   : > { %408 = vst [vmem:[%s802_s14 + $0x20] sm:$0xff] %v345_v43  ;;  %v423_v45 = vadd.f32 %v422_v42, %v345_v43  ;;  %v445_v46 = vmul.f32 %v345_v43, %v345_v43  ;;  %v459_v47 = vadd.f32 %v458_v41, %v444_v40  ;;  %417 = vst [vmem:[%s802_s14 + $0x68] sm:$0xff] %v659_v44 }
  0xea   : > { %v650_v48 = vpop.f32.mrf.mxu0  ;;  %v385_v49 = vpop.f32.mrf.mxu1  ;;  %v454_v13 = vmul.f32 %v659_v44, %v659_v44 }
  0xeb   : > { %v460_v51 = vadd.f32 %v459_v47, %v445_v46  ;;  %411 = vst [vmem:[%s802_s14 + $0x38] sm:$0xff] %v650_v48  ;;  %v424_v52 = vadd.f32 %v647_v38, %v423_v45  ;;  %416 = vst [vmem:[%s802_s14 + $0x60] sm:$0xff] %v385_v49  ;;  %v448_v59 = vmul.f32 %v650_v48, %v650_v48 }
  0xec   : > { %v355_v53 = vpop.f32.mrf.mxu0  ;;  %v662_v54 = vpop.f32.mrf.mxu1  ;;  %v453_v11 = vmul.f32 %v385_v49, %v385_v49 }
  0xed   : > { %410 = vst [vmem:[%s802_s14 + $0x30] sm:$0xff] %v355_v53  ;;  %v425_v55 = vadd.f32 %v424_v52, %v355_v53  ;;  %v447_v56 = vmul.f32 %v355_v53, %v355_v53  ;;  %v461_v57 = vadd.f32 %v460_v51, %v446_v50  ;;  %419 = vst [vmem:[%s802_s14 + $0x78] sm:$0xff] %v662_v54 }
  0xee   : > { %v395_v58 = vpop.f32.mrf.mxu1  ;;  %v456_v19 = vmul.f32 %v662_v54, %v662_v54 }
  0xef   : > { %v426_v60 = vadd.f32 %v650_v48, %v425_v55  ;;  %v462_v61 = vadd.f32 %v461_v57, %v447_v56  ;;  %418 = vst [vmem:[%s802_s14 + $0x70] sm:$0xff] %v395_v58  ;;  %v455_v17 = vmul.f32 %v395_v58, %v395_v58 }
  0xf1   : > { %v463_v62 = vadd.f32 %v462_v61, %v448_v59  ;;  %v427_v63 = vadd.f32 %v426_v60, %v365_v30 }
  0xf3   : > { %v464_v2 = vadd.f32 %v463_v62, %v449_v0  ;;  %v428_v3 = vadd.f32 %v653_v27, %v427_v63 }
  0xf5   : > { %v429_v4 = vadd.f32 %v428_v3, %v375_v39  ;;  %v465_v6 = vadd.f32 %v464_v2, %v450_v1 }
  0xf7   : > { %v466_v8 = vadd.f32 %v465_v6, %v451_v5  ;;  %v430_v9 = vadd.f32 %v656_v34, %v429_v4 }
  0xf9   : > { %v431_v10 = vadd.f32 %v430_v9, %v385_v49  ;;  %v467_v12 = vadd.f32 %v466_v8, %v452_v7 }
  0xfb   : > { %v468_v14 = vadd.f32 %v467_v12, %v453_v11  ;;  %v432_v15 = vadd.f32 %v659_v44, %v431_v10 }
  0xfd   : > { %v433_v16 = vadd.f32 %v432_v15, %v395_v58  ;;  %v469_v18 = vadd.f32 %v468_v14, %v454_v13 }
  0xff   : > { %v434_v20 = vadd.f32 %v662_v54, %v433_v16  ;;  %v470_v21 = vadd.f32 %v469_v18, %v455_v17 }
 0x101   : > { %v435_v22 = vrot.slane %v434_v20, 4  ;;  %v471_v23 = vadd.f32 %v470_v21, %v456_v19 }
 0x103   : > { %v436_v24 = vadd.f32 %v435_v22, %v434_v20  ;;  %v472_v25 = vrot.slane %v471_v23, 4 }
 0x105   : > { %v437_v26 = vrot.slane %v436_v24, 2  ;;  %v473_v27 = vadd.f32 %v472_v25, %v471_v23 }
 0x107   : > { %v438_v28 = vadd.f32 %v437_v26, %v436_v24  ;;  %v474_v29 = vrot.slane %v473_v27, 2 }
 0x109   : > { %v439_v30 = vrot.slane %v438_v28, 1  ;;  %v475_v31 = vadd.f32 %v474_v29, %v473_v27 }
 0x10b   : > { %v476_v32 = vrot.slane %v475_v31, 1  ;;  %v440_v33 = vadd.f32 %v439_v30, %v438_v28 }
 0x10d   : > { %v477_v34 = vadd.f32 %v476_v32, %v475_v31 }
 0x10f   : > { %v479_v35 = vsel %vm478_vm1, %v440_v33, %v477_v34 }
 0x110   : > { %480 = vst [vmem:[%s184_s18] sm:$0x3] %v479_v35 }
 0x111 PF: > { %s14_s12 = sadd.s32 1, %s695_s12  }
 0x112   : > { %p11_p5 = scmp.ge.s32.totalorder %s14_s12, 6  }
 0x114   :  { %13 = sbr.rel (!%p11_p5) target bundleno = 1 (0x1), region = 70 }

</bundles_post_ra>
